<compile_context>
chip_gen: v7x
topology: tpu7x:2x2x1
jax: 0.10.0
libtpu: 0.0.40
codegen_flags: <defaults>
</compile_context>

<pallas_src>
import functools

import jax
import jax.numpy as jnp
import numpy as np
from jax import lax
from jax.experimental import pallas as pl
from jax.experimental.pallas import tpu as pltpu

EPS = 1e-5


# ---------------------------------------------------------------------------
# Wrapper-side weight prep: fold the kw column offsets, stride, and zero
# column-padding of a KxK conv into a lane-expanded matrix so the kernel does
# ONE MXU contraction over lane-dense (rows, W*C) activation slabs.
# ---------------------------------------------------------------------------
def _lane_conv_weight(w_hwio, w_in, w_out, stride, pad):
    """(KH, KW, Ci, Co) -> (KH * w_in * Ci, w_out * Co)."""
    kh, kw, ci, co = w_hwio.shape
    sel = np.zeros((kw, w_in, w_out), np.float32)      # sel[k, p, o] = 1 iff input col p feeds
    for k in range(kw):                                #   output col o through horizontal tap k
        for o in range(w_out):
            p = stride * o + k - pad
            if 0 <= p < w_in:                          # taps that land in the zero padding
                sel[k, p, o] = 1.0                     #   simply get no weight entry
    a = jnp.einsum("wpo,hwic->hpioc", jnp.asarray(sel), w_hwio.astype(jnp.float32))
    return a.reshape(kh * w_in * ci, w_out * co)


def _lane_1x1_weight(w_io, w_in, w_out, stride):
    """(Ci, Co) 1x1/stride conv -> (w_in * Ci, w_out * Co)."""
    ci, co = w_io.shape
    sel = np.zeros((w_in, w_out), np.float32)
    sel[stride * np.arange(w_out), np.arange(w_out)] = 1.0
    a = jnp.einsum("po,ic->pioc", jnp.asarray(sel), w_io.astype(jnp.float32))
    return a.reshape(w_in * ci, w_out * co)


# ---------------------------------------------------------------------------
# Fused BasicBlock kernel: one grid step == B_TILE images.
# ---------------------------------------------------------------------------
def _basic_block_kernel(x_ref, s1_ref, b1_ref, s2_ref, b2_ref, a1_ref, a2_ref,
                        o_ref, hpad_ref, h2pad_ref, *, stride, equal_in_out):
    B, H, WC = x_ref.shape            # lane-dense input block  (B_TILE, H,  W*Cin)
    _, OH, OWC = o_ref.shape          # lane-dense output block (B_TILE, OH, OW*Cout)

    # ---- BN1 + ReLU: f32 on the VPU over full lane-dense rows ---------------
    x = x_ref[...]
    h = jnp.maximum(x * s1_ref[...].reshape(1, 1, WC) + b1_ref[...].reshape(1, 1, WC), 0.0)
    h_bf = h.astype(jnp.bfloat16)     # single cast; MXU operands bf16, accumulation f32

    # ---- conv1 halo (bf16 scratch, row padding only) -------------------------
    # Zero only the two pad rows each step; the interior is fully rewritten every step.
    zrow1 = jnp.zeros((B, 1, WC), dtype=hpad_ref.dtype)
    hpad_ref[:, 0:1, :] = zrow1
    hpad_ref[:, H + 1:H + 2, :] = zrow1
    hpad_ref[:, 1:H + 1, :] = h_bf

    def row_slab(ref, kh, rows, width, s):
        # Read the kh-th row slab straight off the scratch ref (keeps live ranges short).
        if s == 1:
            v = ref[:, kh:kh + rows, :]
        else:
            v = ref[:, pl.ds(kh, rows, s), :]          # strided sublane read (stride-2 blocks)
        return v.reshape(B * rows, width)

    # ---- conv1: ONE MXU contraction, M = B_TILE*OH, K = 3*W*Cin ---------------
    patches1 = jnp.concatenate(
        [row_slab(hpad_ref, kh, OH, WC, stride) for kh in range(3)], axis=1)
    c1 = jnp.dot(patches1, a1_ref[...], preferred_element_type=jnp.float32)   # (B*OH, OW*Cout)

    # ---- BN2 + ReLU (dropRate == 0 -> dropout is identity) --------------------
    h2 = jnp.maximum(c1 * s2_ref[...] + b2_ref[...], 0.0)
    h2_bf = h2.reshape(B, OH, OWC).astype(jnp.bfloat16)

    # ---- conv2 halo ------------------------------------------------------------
    zrow2 = jnp.zeros((B, 1, OWC), dtype=h2pad_ref.dtype)
    h2pad_ref[:, 0:1, :] = zrow2
    h2pad_ref[:, OH + 1:OH + 2, :] = zrow2
    h2pad_ref[:, 1:OH + 1, :] = h2_bf

    # ---- conv2 (+ fused 1x1 shortcut): ONE MXU contraction ---------------------
    slabs2 = [row_slab(h2pad_ref, kh, OH, OWC, 1) for kh in range(3)]
    if not equal_in_out:
        # The 1x1/stride shortcut's K rows are h itself; its weight is stacked under conv2's.
        h_sc = h_bf if stride == 1 else h_bf[:, ::stride, :]
        slabs2.append(h_sc.reshape(B * OH, WC))
    patches2 = jnp.concatenate(slabs2, axis=1)
    acc = jnp.dot(patches2, a2_ref[...], preferred_element_type=jnp.float32)  # (B*OH, OW*Cout)

    # ---- residual epilogue ------------------------------------------------------
    if equal_in_out:                   # identity shortcut (stride == 1, Cin == Cout)
        acc = acc + x.reshape(B * OH, OWC)

    o_ref[...] = acc.reshape(B, OH, OWC).astype(o_ref.dtype)


# ---------------------------------------------------------------------------
# Wrapper: one pallas_call for the whole block.
# ---------------------------------------------------------------------------
def _pick_batch_tile(n, per_image_bytes, budget_bytes=8 << 20):
    bt = int(max(1, min(n, budget_bytes // max(per_image_bytes, 1))))
    if n >= 2:
        bt = min(bt, (n + 1) // 2)     # keep >= 2 grid steps so both v7x TCs get work
    while n % bt:                       # even blocks only (no ragged last step)
        bt -= 1
    return bt


def basic_block_forward(x_nchw, params, *, stride, equal_in_out,
                        batch_tile=None, out_dtype=jnp.float32):
    if equal_in_out:
        # The identity residual is only shape-correct for stride == 1 / Cin == Cout.
        assert stride == 1, "equalInOut=True requires stride == 1"

    x_nhwc = jnp.transpose(x_nchw, (0, 2, 3, 1)).astype(jnp.float32)   # NCHW -> NHWC
    n, h, w, cin = x_nhwc.shape
    cout = params["w_conv1"].shape[-1]
    if equal_in_out:
        assert cin == cout, "equalInOut=True requires in_planes == out_planes"
    oh = (h - 1) // stride + 1
    ow = (w - 1) // stride + 1

    x = x_nhwc.reshape(n, h, w * cin)                 # lane-dense activations (N, H, W*Cin)

    # Fold BN (inference form) into per-channel scale/shift, pre-tiled lane-dense.
    scale1 = params["gamma1"] / jnp.sqrt(params["var1"] + EPS)
    bias1 = params["beta1"] - params["mean1"] * scale1
    scale2 = params["gamma2"] / jnp.sqrt(params["var2"] + EPS)
    bias2 = params["beta2"] - params["mean2"] * scale2
    s1 = jnp.tile(scale1, w).reshape(1, w * cin)
    b1 = jnp.tile(bias1, w).reshape(1, w * cin)
    s2 = jnp.tile(scale2, ow).reshape(1, ow * cout)
    b2 = jnp.tile(bias2, ow).reshape(1, ow * cout)

    # Lane-expanded conv weights (bf16 MXU operands). The 1x1 shortcut is stacked under
    # conv2's weight so conv2 + shortcut are a single contraction.
    a1 = _lane_conv_weight(params["w_conv1"], w, ow, stride, pad=1)    # (3*W*Cin,   OW*Cout)
    a2 = _lane_conv_weight(params["w_conv2"], ow, ow, 1, pad=1)        # (3*OW*Cout, OW*Cout)
    if not equal_in_out:
        a2 = jnp.concatenate([a2, _lane_1x1_weight(params["w_short"], w, ow, stride)], axis=0)
    a1 = a1.astype(jnp.bfloat16)
    a2 = a2.astype(jnp.bfloat16)

    # Batch tile: amortize per-step overhead within a conservative VMEM budget.
    per_image = (h * w * cin + oh * ow * cout) * 4 * 2 \
        + ((h + 2) * w * cin + (oh + 2) * ow * cout) * 2
    bt = batch_tile if batch_tile is not None else _pick_batch_tile(n, per_image)
    assert n % bt == 0, (n, bt)

    block_bytes = bt * (h * w * cin + oh * ow * cout) * 4
    scratch_bytes = bt * ((h + 2) * w * cin + (oh + 2) * ow * cout) * 2
    weight_bytes = (a1.size + a2.size) * 2 + 2 * (w * cin + ow * cout) * 4
    vmem_need = 2 * block_bytes + scratch_bytes + weight_bytes
    # Explicit scoped-VMEM limit (v5e default is 16 MiB; cap well under v7x's 64 MiB physical).
    vmem_limit = int(min(max(4 * vmem_need, 16 << 20), 48 << 20))

    kern = functools.partial(_basic_block_kernel, stride=stride, equal_in_out=equal_in_out)
    out = pl.pallas_call(
        kern,
        # out_dtype can be bf16 if the next block consumes bf16 (halves writeback);
        # residual math stays f32 in-kernel either way.
        out_shape=jax.ShapeDtypeStruct((n, oh, ow * cout), out_dtype),
        grid_spec=pltpu.PrefetchScalarGridSpec(
            num_scalar_prefetch=0,
            grid=(n // bt,),
            in_specs=[
                pl.BlockSpec((bt, h, w * cin), lambda b: (b, 0, 0)),
                pl.BlockSpec((1, w * cin), lambda b: (0, 0)),
                pl.BlockSpec((1, w * cin), lambda b: (0, 0)),
                pl.BlockSpec((1, ow * cout), lambda b: (0, 0)),
                pl.BlockSpec((1, ow * cout), lambda b: (0, 0)),
                pl.BlockSpec(a1.shape, lambda b: (0, 0)),
                pl.BlockSpec(a2.shape, lambda b: (0, 0)),
            ],
            out_specs=pl.BlockSpec((bt, oh, ow * cout), lambda b: (b, 0, 0)),
            scratch_shapes=[
                pltpu.VMEM((bt, h + 2, w * cin), jnp.bfloat16),     # conv1 row-halo (bf16)
                pltpu.VMEM((bt, oh + 2, ow * cout), jnp.bfloat16),  # conv2 row-halo (bf16)
            ]),
        compiler_params=pltpu.CompilerParams(
            dimension_semantics=("parallel",),
            vmem_limit_bytes=vmem_limit),
    )(x, s1, b1, s2, b2, a1, a2)

    out = out.reshape(n, oh, ow, cout)
    return jnp.transpose(out, (0, 3, 1, 2))                           # back to NCHW


# ---------------------------------------------------------------------------
# Reference (precision-matched: bf16 conv operands, f32 accumulation, pad=1).
# ---------------------------------------------------------------------------
def _ref_forward(x_nchw, params, *, stride, equal_in_out):
    x = jnp.transpose(x_nchw, (0, 2, 3, 1)).astype(jnp.float32)
    dn = ("NHWC", "HWIO", "NHWC")
    bf = jnp.bfloat16

    def bn_relu(v, g, b, m, var):
        return jnp.maximum((v - m) / jnp.sqrt(var + EPS) * g + b, 0.0)

    h = bn_relu(x, params["gamma1"], params["beta1"], params["mean1"], params["var1"])
    c1 = lax.conv_general_dilated(h.astype(bf), params["w_conv1"].astype(bf),
                                  (stride, stride), [(1, 1), (1, 1)],
                                  dimension_numbers=dn,
                                  preferred_element_type=jnp.float32)
    h2 = bn_relu(c1, params["gamma2"], params["beta2"], params["mean2"], params["var2"])
    c2 = lax.conv_general_dilated(h2.astype(bf), params["w_conv2"].astype(bf),
                                  (1, 1), [(1, 1), (1, 1)],
                                  dimension_numbers=dn,
                                  preferred_element_type=jnp.float32)
    if equal_in_out:
        y = x + c2
    else:
        sc = lax.conv_general_dilated(h.astype(bf),
                                      params["w_short"][None, None].astype(bf),
                                      (stride, stride), "VALID",
                                      dimension_numbers=dn,
                                      preferred_element_type=jnp.float32)
        y = sc + c2
    return jnp.transpose(y, (0, 3, 1, 2))


def _make_params(key, cin, cout):
    k1, k2, k3 = jax.random.split(key, 3)
    af = lambda c: jnp.arange(c, dtype=jnp.float32)
    return {
        "gamma1": 1.0 + 0.10 * af(cin), "beta1": 0.01 * af(cin),
        "mean1": 0.05 * af(cin), "var1": 1.0 + 0.02 * af(cin),
        "gamma2": 1.0 - 0.05 * af(cout), "beta2": -0.02 * af(cout),
        "mean2": 0.03 * af(cout), "var2": 1.0 + 0.01 * af(cout),
        "w_conv1": jax.random.normal(k1, (3, 3, cin, cout), jnp.float32)
                   * (2.0 / (9 * cin)) ** 0.5,
        "w_conv2": jax.random.normal(k2, (3, 3, cout, cout), jnp.float32)
                   * (2.0 / (9 * cout)) ** 0.5,
        "w_short": jax.random.normal(k3, (cin, cout), jnp.float32) * (2.0 / cin) ** 0.5,
    }


# ---------------------------------------------------------------------------
if __name__ == "__main__":
    key = jax.random.PRNGKey(0)

    def run_case(cin, cout, stride, n=4, hw=16):
        equal = cin == cout
        kcase = jax.random.fold_in(key, cin * 100 + cout)
        kx, kp = jax.random.split(kcase)
        x = jax.random.normal(kx, (n, cin, hw, hw), dtype=jnp.float32)    # NCHW
        params = _make_params(kp, cin, cout)

        fwd = jax.jit(functools.partial(basic_block_forward, stride=stride,
                                        equal_in_out=equal))
        y = fwd(x, params)
        jax.block_until_ready(y)

        y_ref = _ref_forward(x, params, stride=stride, equal_in_out=equal)
        oh = (hw - 1) // stride + 1
        assert y.shape == (n, cout, oh, oh), y.shape
        err = float(jnp.max(jnp.abs(y - y_ref)))
        assert jnp.allclose(y, y_ref, atol=2e-2, rtol=2e-2), (cin, cout, stride, err)

    # BasicBlock(in_planes=4, out_planes=8, stride=1): fused 1x1-shortcut path.
    run_case(4, 8, 1)
    # BasicBlock(in_planes=8, out_planes=8, stride=1): equalInOut identity-residual path.
    run_case(8, 8, 1)

    print("KERNEL_OK")
</pallas_src>

<mosaic_0001>
module attributes {stable_mosaic.version = 11 : i64} {
  func.func @_basic_block_kernel(%arg0: i32, %arg1: memref<2x16x64xf32, #tpu.memory_space<vmem>>, %arg2: memref<1x64xf32, #tpu.memory_space<vmem>>, %arg3: memref<1x64xf32, #tpu.memory_space<vmem>>, %arg4: memref<1x128xf32, #tpu.memory_space<vmem>>, %arg5: memref<1x128xf32, #tpu.memory_space<vmem>>, %arg6: memref<192x128xbf16, #tpu.memory_space<vmem>>, %arg7: memref<448x128xbf16, #tpu.memory_space<vmem>>, %arg8: memref<2x16x128xf32, #tpu.memory_space<vmem>>, %arg9: memref<2x18x64xbf16, #tpu.memory_space<vmem>>, %arg10: memref<2x18x128xbf16, #tpu.memory_space<vmem>>) attributes {dimension_semantics = [#tpu.dimension_semantics<parallel>], iteration_bounds = array<i64: 2>, scalar_prefetch = 0 : i64, scratch_operands = 2 : i64, tpu.core_type = #tpu.core_type<tc>, window_params = [{transform_indices = @transform_0, window_bounds = array<i64: 2, 16, 64>}, {pipeline_mode = #tpu.pipeline_mode<synchronous>, transform_indices = @transform_1, window_bounds = array<i64: 1, 64>}, {pipeline_mode = #tpu.pipeline_mode<synchronous>, transform_indices = @transform_2, window_bounds = array<i64: 1, 64>}, {pipeline_mode = #tpu.pipeline_mode<synchronous>, transform_indices = @transform_3, window_bounds = array<i64: 1, 128>}, {pipeline_mode = #tpu.pipeline_mode<synchronous>, transform_indices = @transform_4, window_bounds = array<i64: 1, 128>}, {pipeline_mode = #tpu.pipeline_mode<synchronous>, transform_indices = @transform_5, window_bounds = array<i64: 192, 128>}, {pipeline_mode = #tpu.pipeline_mode<synchronous>, transform_indices = @transform_6, window_bounds = array<i64: 448, 128>}, {transform_indices = @transform_7, window_bounds = array<i64: 2, 16, 128>}]} {
    %c0 = arith.constant 0 : index
    %c0_0 = arith.constant 0 : index
    %c0_1 = arith.constant 0 : index
    %0 = vector.load %arg1[%c0, %c0_0, %c0_1] : memref<2x16x64xf32, #tpu.memory_space<vmem>>, vector<2x16x64xf32>
    %c0_2 = arith.constant 0 : index
    %c0_3 = arith.constant 0 : index
    %1 = vector.load %arg2[%c0_2, %c0_3] : memref<1x64xf32, #tpu.memory_space<vmem>>, vector<1x64xf32>
    %2 = vector.shape_cast %1 : vector<1x64xf32> to vector<1x1x64xf32>
    %3 = vector.broadcast %2 : vector<1x1x64xf32> to vector<2x16x64xf32>
    %4 = arith.mulf %0, %3 : vector<2x16x64xf32>
    %c0_4 = arith.constant 0 : index
    %c0_5 = arith.constant 0 : index
    %5 = vector.load %arg3[%c0_4, %c0_5] : memref<1x64xf32, #tpu.memory_space<vmem>>, vector<1x64xf32>
    %6 = vector.shape_cast %5 : vector<1x64xf32> to vector<1x1x64xf32>
    %7 = vector.broadcast %6 : vector<1x1x64xf32> to vector<2x16x64xf32>
    %8 = arith.addf %4, %7 : vector<2x16x64xf32>
    %cst = arith.constant 0.000000e+00 : f32
    %9 = vector.broadcast %cst : f32 to vector<2x16x64xf32>
    %10 = arith.maximumf %8, %9 : vector<2x16x64xf32>
    %11 = arith.truncf %10 : vector<2x16x64xf32> to vector<2x16x64xbf16>
    %cst_6 = arith.constant 0.000000e+00 : bf16
    %12 = vector.broadcast %cst_6 : bf16 to vector<2x1x64xbf16>
    %c0_7 = arith.constant 0 : index
    %c0_8 = arith.constant 0 : index
    %c0_9 = arith.constant 0 : index
    %13 = vector.load %arg9[%c0_7, %c0_8, %c0_9] : memref<2x18x64xbf16, #tpu.memory_space<vmem>>, vector<2x1x64xbf16>
    tpu.vector_store %arg9[%c0_7, %c0_8, %c0_9], %12 {strides = array<i32>} : memref<2x18x64xbf16, #tpu.memory_space<vmem>>, vector<2x1x64xbf16>,
    %c0_10 = arith.constant 0 : index
    %c17 = arith.constant 17 : index
    %c0_11 = arith.constant 0 : index
    %14 = vector.load %arg9[%c0_10, %c17, %c0_11] : memref<2x18x64xbf16, #tpu.memory_space<vmem>>, vector<2x1x64xbf16>
    tpu.vector_store %arg9[%c0_10, %c17, %c0_11], %12 {strides = array<i32>} : memref<2x18x64xbf16, #tpu.memory_space<vmem>>, vector<2x1x64xbf16>,
    %c0_12 = arith.constant 0 : index
    %c1 = arith.constant 1 : index
    %c0_13 = arith.constant 0 : index
    %15 = vector.load %arg9[%c0_12, %c1, %c0_13] : memref<2x18x64xbf16, #tpu.memory_space<vmem>>, vector<2x16x64xbf16>
    tpu.vector_store %arg9[%c0_12, %c1, %c0_13], %11 {strides = array<i32>} : memref<2x18x64xbf16, #tpu.memory_space<vmem>>, vector<2x16x64xbf16>,
    %c0_14 = arith.constant 0 : index
    %c0_15 = arith.constant 0 : index
    %c0_16 = arith.constant 0 : index
    %16 = vector.load %arg9[%c0_14, %c0_15, %c0_16] : memref<2x18x64xbf16, #tpu.memory_space<vmem>>, vector<2x16x64xbf16>
    %17 = vector.shape_cast %16 : vector<2x16x64xbf16> to vector<32x64xbf16>
    %c0_17 = arith.constant 0 : index
    %c1_18 = arith.constant 1 : index
    %c0_19 = arith.constant 0 : index
    %18 = vector.load %arg9[%c0_17, %c1_18, %c0_19] : memref<2x18x64xbf16, #tpu.memory_space<vmem>>, vector<2x16x64xbf16>
    %19 = vector.shape_cast %18 : vector<2x16x64xbf16> to vector<32x64xbf16>
    %c0_20 = arith.constant 0 : index
    %c2 = arith.constant 2 : index
    %c0_21 = arith.constant 0 : index
    %20 = vector.load %arg9[%c0_20, %c2, %c0_21] : memref<2x18x64xbf16, #tpu.memory_space<vmem>>, vector<2x16x64xbf16>
    %21 = vector.shape_cast %20 : vector<2x16x64xbf16> to vector<32x64xbf16>
    %22 = tpu.concatenate %17, %19, %21 in 1 : vector<32x64xbf16>, vector<32x64xbf16>, vector<32x64xbf16> -> vector<32x192xbf16>
    %c0_22 = arith.constant 0 : index
    %c0_23 = arith.constant 0 : index
    %23 = vector.load %arg6[%c0_22, %c0_23] : memref<192x128xbf16, #tpu.memory_space<vmem>>, vector<192x128xbf16>
    %cst_24 = arith.constant dense<0.000000e+00> : vector<32x128xf32>
    %24 = tpu.matmul %22, %23, %cst_24 {dimension_numbers = #tpu.dot_dimension_numbers<[1], [0], [0], [1], [0, 0, 1, 1], [], []>} : vector<32x192xbf16>, vector<192x128xbf16>, vector<32x128xf32> -> vector<32x128xf32>
    %c0_25 = arith.constant 0 : index
    %c0_26 = arith.constant 0 : index
    %25 = vector.load %arg4[%c0_25, %c0_26] : memref<1x128xf32, #tpu.memory_space<vmem>>, vector<1x128xf32>
    %26 = vector.broadcast %25 : vector<1x128xf32> to vector<32x128xf32>
    %27 = arith.mulf %24, %26 : vector<32x128xf32>
    %c0_27 = arith.constant 0 : index
    %c0_28 = arith.constant 0 : index
    %28 = vector.load %arg5[%c0_27, %c0_28] : memref<1x128xf32, #tpu.memory_space<vmem>>, vector<1x128xf32>
    %29 = vector.broadcast %28 : vector<1x128xf32> to vector<32x128xf32>
    %30 = arith.addf %27, %29 : vector<32x128xf32>
    %cst_29 = arith.constant 0.000000e+00 : f32
    %31 = vector.broadcast %cst_29 : f32 to vector<32x128xf32>
    %32 = arith.maximumf %30, %31 : vector<32x128xf32>
    %33 = vector.shape_cast %32 : vector<32x128xf32> to vector<2x16x128xf32>
    %34 = arith.truncf %33 : vector<2x16x128xf32> to vector<2x16x128xbf16>
    %cst_30 = arith.constant 0.000000e+00 : bf16
    %35 = vector.broadcast %cst_30 : bf16 to vector<2x1x128xbf16>
    %c0_31 = arith.constant 0 : index
    %c0_32 = arith.constant 0 : index
    %c0_33 = arith.constant 0 : index
    %36 = vector.load %arg10[%c0_31, %c0_32, %c0_33] : memref<2x18x128xbf16, #tpu.memory_space<vmem>>, vector<2x1x128xbf16>
    tpu.vector_store %arg10[%c0_31, %c0_32, %c0_33], %35 {strides = array<i32>} : memref<2x18x128xbf16, #tpu.memory_space<vmem>>, vector<2x1x128xbf16>,
    %c0_34 = arith.constant 0 : index
    %c17_35 = arith.constant 17 : index
    %c0_36 = arith.constant 0 : index
    %37 = vector.load %arg10[%c0_34, %c17_35, %c0_36] : memref<2x18x128xbf16, #tpu.memory_space<vmem>>, vector<2x1x128xbf16>
    tpu.vector_store %arg10[%c0_34, %c17_35, %c0_36], %35 {strides = array<i32>} : memref<2x18x128xbf16, #tpu.memory_space<vmem>>, vector<2x1x128xbf16>,
    %c0_37 = arith.constant 0 : index
    %c1_38 = arith.constant 1 : index
    %c0_39 = arith.constant 0 : index
    %38 = vector.load %arg10[%c0_37, %c1_38, %c0_39] : memref<2x18x128xbf16, #tpu.memory_space<vmem>>, vector<2x16x128xbf16>
    tpu.vector_store %arg10[%c0_37, %c1_38, %c0_39], %34 {strides = array<i32>} : memref<2x18x128xbf16, #tpu.memory_space<vmem>>, vector<2x16x128xbf16>,
    %c0_40 = arith.constant 0 : index
    %c0_41 = arith.constant 0 : index
    %c0_42 = arith.constant 0 : index
    %39 = vector.load %arg10[%c0_40, %c0_41, %c0_42] : memref<2x18x128xbf16, #tpu.memory_space<vmem>>, vector<2x16x128xbf16>
    %40 = vector.shape_cast %39 : vector<2x16x128xbf16> to vector<32x128xbf16>
    %c0_43 = arith.constant 0 : index
    %c1_44 = arith.constant 1 : index
    %c0_45 = arith.constant 0 : index
    %41 = vector.load %arg10[%c0_43, %c1_44, %c0_45] : memref<2x18x128xbf16, #tpu.memory_space<vmem>>, vector<2x16x128xbf16>
    %42 = vector.shape_cast %41 : vector<2x16x128xbf16> to vector<32x128xbf16>
    %c0_46 = arith.constant 0 : index
    %c2_47 = arith.constant 2 : index
    %c0_48 = arith.constant 0 : index
    %43 = vector.load %arg10[%c0_46, %c2_47, %c0_48] : memref<2x18x128xbf16, #tpu.memory_space<vmem>>, vector<2x16x128xbf16>
    %44 = vector.shape_cast %43 : vector<2x16x128xbf16> to vector<32x128xbf16>
    %45 = vector.shape_cast %11 : vector<2x16x64xbf16> to vector<32x64xbf16>
    %46 = tpu.concatenate %40, %42, %44, %45 in 1 : vector<32x128xbf16>, vector<32x128xbf16>, vector<32x128xbf16>, vector<32x64xbf16> -> vector<32x448xbf16>
    %c0_49 = arith.constant 0 : index
    %c0_50 = arith.constant 0 : index
    %47 = vector.load %arg7[%c0_49, %c0_50] : memref<448x128xbf16, #tpu.memory_space<vmem>>, vector<448x128xbf16>
    %cst_51 = arith.constant dense<0.000000e+00> : vector<32x128xf32>
    %48 = tpu.matmul %46, %47, %cst_51 {dimension_numbers = #tpu.dot_dimension_numbers<[1], [0], [0], [1], [0, 0, 1, 1], [], []>} : vector<32x448xbf16>, vector<448x128xbf16>, vector<32x128xf32> -> vector<32x128xf32>
    %49 = vector.shape_cast %48 : vector<32x128xf32> to vector<2x16x128xf32>
    %c0_52 = arith.constant 0 : index
    %c0_53 = arith.constant 0 : index
    %c0_54 = arith.constant 0 : index
    %50 = vector.load %arg8[%c0_52, %c0_53, %c0_54] : memref<2x16x128xf32, #tpu.memory_space<vmem>>, vector<2x16x128xf32>
    tpu.vector_store %arg8[%c0_52, %c0_53, %c0_54], %49 {strides = array<i32>} : memref<2x16x128xf32, #tpu.memory_space<vmem>>, vector<2x16x128xf32>,
    return
  }
  func.func @transform_0(%arg0: i32) -> (i32, i32, i32) {
    %c0_i32 = arith.constant 0 : i32
    %c0_i32_0 = arith.constant 0 : i32
    %c0_i32_1 = arith.constant 0 : i32
    return %arg0, %c0_i32, %c0_i32_0 : i32, i32, i32
  }
  func.func @transform_1(%arg0: i32) -> (i32, i32) {
    %c0_i32 = arith.constant 0 : i32
    %c0_i32_0 = arith.constant 0 : i32
    %c0_i32_1 = arith.constant 0 : i32
    return %c0_i32, %c0_i32_0 : i32, i32
  }
  func.func @transform_2(%arg0: i32) -> (i32, i32) {
    %c0_i32 = arith.constant 0 : i32
    %c0_i32_0 = arith.constant 0 : i32
    %c0_i32_1 = arith.constant 0 : i32
    return %c0_i32, %c0_i32_0 : i32, i32
  }
  func.func @transform_3(%arg0: i32) -> (i32, i32) {
    %c0_i32 = arith.constant 0 : i32
    %c0_i32_0 = arith.constant 0 : i32
    %c0_i32_1 = arith.constant 0 : i32
    return %c0_i32, %c0_i32_0 : i32, i32
  }
  func.func @transform_4(%arg0: i32) -> (i32, i32) {
    %c0_i32 = arith.constant 0 : i32
    %c0_i32_0 = arith.constant 0 : i32
    %c0_i32_1 = arith.constant 0 : i32
    return %c0_i32, %c0_i32_0 : i32, i32
  }
  func.func @transform_5(%arg0: i32) -> (i32, i32) {
    %c0_i32 = arith.constant 0 : i32
    %c0_i32_0 = arith.constant 0 : i32
    %c0_i32_1 = arith.constant 0 : i32
    return %c0_i32, %c0_i32_0 : i32, i32
  }
  func.func @transform_6(%arg0: i32) -> (i32, i32) {
    %c0_i32 = arith.constant 0 : i32
    %c0_i32_0 = arith.constant 0 : i32
    %c0_i32_1 = arith.constant 0 : i32
    return %c0_i32, %c0_i32_0 : i32, i32
  }
  func.func @transform_7(%arg0: i32) -> (i32, i32, i32) {
    %c0_i32 = arith.constant 0 : i32
    %c0_i32_0 = arith.constant 0 : i32
    %c0_i32_1 = arith.constant 0 : i32
    return %arg0, %c0_i32, %c0_i32_0 : i32, i32, i32
  }
}

</mosaic_0001>

<bundles_post_ra>
// kernel: tile.23
= control target key start
LH: loop header
LB: loop body
LE: loop exit
PB: predicated region body
PF: predicated region fallthrough
CT: control target
= control target key end

     0   :  { %s28_s0 = inlined_call_operand.vmem [shape: f32[4], index: 0, kind: input, shape index: {}]   ;;  %s29_s1 = inlined_call_operand.vmem [shape: f32[16,4], index: 1, kind: output, shape index: {}]  }
   0x1   :  { %v4_v0 = vld [vmem:[%s28_s0] ss:$0 sm:$0xff] }
   0x2   :  { %5 = vst [vmem:[%s29_s1] sm:$0xff] %v4_v0  ;;  %8 = vst [vmem:[%s29_s1 + $0x8] sm:$0xff] %v4_v0 }

// kernel: tile.24
= control target key start
LH: loop header
LB: loop body
LE: loop exit
PB: predicated region body
PF: predicated region fallthrough
CT: control target
= control target key end

     0   :  { %s131_s10 = smov 60   ;;  %s132_s11 = smov 52   ;;  %vm3_vm0 = vcmask 31744   ;;  %vm9_vm1 = vcmask 523744   ;;  %vm15_vm2 = vcmask 490944   ;;  %vm21_vm3 = vcmask 458144   ;;  %s207_s0 = inlined_call_operand.vmem [shape: f32[16,4], index: 0, kind: input, shape index: {}]   ;;  %s208_s1 = inlined_call_operand.vmem [shape: f32[1,64], index: 1, kind: output, shape index: {}]  }
   0x1   :  { %v101_v0 = vld [vmem:[%s207_s0 + $0xf] sm:$0x1]   ;;  %v103_v1 = vld [vmem:[%s207_s0 + $0xd] sm:$0x1]   ;;  %v102_v2 = vld [vmem:[%s207_s0 + $0xe] sm:$0x1]  }
   0x2   :  { %7 = vrot.lane.b32.xlu0 %v101_v0, %s131_s10  ;;  %19 = vrot.lane.b32.xlu1 %v103_v1, %s132_s11  ;;  %v104_v3 = vld [vmem:[%s207_s0 + $0xc] sm:$0x1]   ;;  %s133_s16 = smov 56   ;;  %s134_s17 = smov 48   ;;  %v105_v4 = vld [vmem:[%s207_s0 + $0xb] sm:$0x1]  }
   0x3   :  { %v106_v5 = vld [vmem:[%s207_s0 + $0xa] sm:$0x1]   ;;  %v2_v6 = vld [vmem:[%s207_s0] sm:$0x1]   ;;  %s135_s24 = smov 44   ;;  %s136_s25 = smov 40  }
   0x4   :  { %4 = vst.msk [vmem:[#allocation0] sm:$0x1] %vm3_vm0, %v2_v6   ;;  %v107_v7 = vld [vmem:[%s207_s0 + $0x9] sm:$0x1]   ;;  %v108_v8 = vld [vmem:[%s207_s0 + $0x8] sm:$0x1]  }
   0x5   :  { %s137_s30 = smov 36   ;;  %s138_s2 = smov 32   ;;  %v109_v9 = vld [vmem:[%s207_s0 + $0x7] sm:$0x1]   ;;  %v110_v10 = vld [vmem:[%s207_s0 + $0x6] sm:$0x1]  }
   0x6   :  { %13 = vrot.lane.b32.xlu0 %v102_v2, %s133_s16  ;;  %25 = vrot.lane.b32.xlu1 %v104_v3, %s134_s17  ;;  %s139_s7 = smov 28   ;;  %s140_s8 = smov 24   ;;  %v111_v11 = vld [vmem:[%s207_s0 + $0x5] sm:$0x1]   ;;  %v112_v12 = vld [vmem:[%s207_s0 + $0x4] sm:$0x1]  }
   0x7   :  { %s141_s13 = smov 20   ;;  %s142_s14 = smov 16   ;;  %v113_v13 = vld [vmem:[%s207_s0 + $0x3] sm:$0x1]   ;;  %v114_v14 = vld [vmem:[%s207_s0 + $0x2] sm:$0x1]  }
   0x8   :  { %s143_s19 = smov 12   ;;  %s144_s20 = smov 8   ;;  %v115_v15 = vld [vmem:[%s207_s0 + $0x1] sm:$0x1]   ;;  %vm27_vm4 = vcmask 425344   ;;  %vm33_vm5 = vcmask 392544  }
   0x9   :  { %s145_s0 = smov 4   ;;  %vm39_vm6 = vcmask 359744   ;;  %vm45_vm7 = vcmask 326944   ;;  %vm51_vm8 = vcmask 294144   ;;  %vm57_vm9 = vcmask 261344  }
   0xa   :  { %31 = vrot.lane.b32.xlu0 %v105_v4, %s135_s24  ;;  %37 = vrot.lane.b32.xlu1 %v106_v5, %s136_s25  ;;  %vm63_vm10 = vcmask 228544   ;;  %vm69_vm11 = vcmask 195744   ;;  %vm75_vm12 = vcmask 162944   ;;  %vm81_vm13 = vcmask 130144  }
   0xb   :  { %vm87_vm14 = vcmask 97344   ;;  %vm93_vm15 = vcmask 64544  }
   0xe   :  { %43 = vrot.lane.b32.xlu0 %v107_v7, %s137_s30  ;;  %49 = vrot.lane.b32.xlu1 %v108_v8, %s138_s2 }
  0x12   :  { %55 = vrot.lane.b32.xlu0 %v109_v9, %s139_s7  ;;  %61 = vrot.lane.b32.xlu1 %v110_v10, %s140_s8 }
  0x16   :  { %67 = vrot.lane.b32.xlu0 %v111_v11, %s141_s13  ;;  %73 = vrot.lane.b32.xlu1 %v112_v12, %s142_s14 }
  0x1a   :  { %79 = vrot.lane.b32.xlu0 %v113_v13, %s143_s19  ;;  %85 = vrot.lane.b32.xlu1 %v114_v14, %s144_s20 }
  0x1e   :  { %91 = vrot.lane.b32.xlu0 %v115_v15, %s145_s0 }
  0x74   :  { %v8_v16 = vpop.permute.xlu0 %7   ;;  %v20_v17 = vpop.permute.xlu1 %19  }
  0x75   :  { %10 = vst.msk [vmem:[#allocation0] sm:$0x1] %vm9_vm1, %v8_v16  }
  0x78   :  { %v14_v18 = vpop.permute.xlu0 %13   ;;  %v26_v19 = vpop.permute.xlu1 %25  }
  0x79   :  { %16 = vst.msk [vmem:[#allocation0] sm:$0x1] %vm15_vm2, %v14_v18  }
  0x7a   :  { %22 = vst.msk [vmem:[#allocation0] sm:$0x1] %vm21_vm3, %v20_v17  }
  0x7b   :  { %28 = vst.msk [vmem:[#allocation0] sm:$0x1] %vm27_vm4, %v26_v19  }
  0x7c   :  { %v32_v20 = vpop.permute.xlu0 %31   ;;  %v38_v21 = vpop.permute.xlu1 %37  }
  0x7d   :  { %34 = vst.msk [vmem:[#allocation0] sm:$0x1] %vm33_vm5, %v32_v20  }
  0x7e   :  { %40 = vst.msk [vmem:[#allocation0] sm:$0x1] %vm39_vm6, %v38_v21  }
  0x80   :  { %v44_v22 = vpop.permute.xlu0 %43   ;;  %v50_v23 = vpop.permute.xlu1 %49  }
  0x81   :  { %46 = vst.msk [vmem:[#allocation0] sm:$0x1] %vm45_vm7, %v44_v22  }
  0x82   :  { %52 = vst.msk [vmem:[#allocation0] sm:$0x1] %vm51_vm8, %v50_v23  }
  0x84   :  { %v56_v24 = vpop.permute.xlu0 %55   ;;  %v62_v25 = vpop.permute.xlu1 %61  }
  0x85   :  { %58 = vst.msk [vmem:[#allocation0] sm:$0x1] %vm57_vm9, %v56_v24  }
  0x86   :  { %64 = vst.msk [vmem:[#allocation0] sm:$0x1] %vm63_vm10, %v62_v25  }
  0x88   :  { %v68_v26 = vpop.permute.xlu0 %67   ;;  %v74_v27 = vpop.permute.xlu1 %73  }
  0x89   :  { %70 = vst.msk [vmem:[#allocation0] sm:$0x1] %vm69_vm11, %v68_v26  }
  0x8a   :  { %76 = vst.msk [vmem:[#allocation0] sm:$0x1] %vm75_vm12, %v74_v27  }
  0x8c   :  { %v80_v28 = vpop.permute.xlu0 %79   ;;  %v86_v29 = vpop.permute.xlu1 %85  }
  0x8d   :  { %82 = vst.msk [vmem:[#allocation0] sm:$0x1] %vm81_vm13, %v80_v28  }
  0x8e   :  { %88 = vst.msk [vmem:[#allocation0] sm:$0x1] %vm87_vm14, %v86_v29  }
  0x90   :  { %v92_v30 = vpop.permute.xlu0 %91  }
  0x91   :  { %94 = vst.msk [vmem:[#allocation0] sm:$0x1] %vm93_vm15, %v92_v30  }
  0x98   :  { %v98_v31 = vld [vmem:[#allocation0] sm:$0x1] }
  0x99   :  { %100 = vst [vmem:[%s208_s1] sm:$0x1] %v98_v31 }

// kernel: tile.33
= control target key start
LH: loop header
LB: loop body
LE: loop exit
PB: predicated region body
PF: predicated region fallthrough
CT: control target
= control target key end

     0   :  { %s28_s0 = inlined_call_operand.vmem [shape: f32[8], index: 0, kind: input, shape index: {}]   ;;  %s29_s1 = inlined_call_operand.vmem [shape: f32[16,8], index: 1, kind: output, shape index: {}]  }
   0x1   :  { %v4_v0 = vld [vmem:[%s28_s0] ss:$0 sm:$0xff] }
   0x2   :  { %5 = vst [vmem:[%s29_s1] sm:$0xff] %v4_v0  ;;  %8 = vst [vmem:[%s29_s1 + $0x8] sm:$0xff] %v4_v0 }

// kernel: tile.34
= control target key start
LH: loop header
LB: loop body
LE: loop exit
PB: predicated region body
PF: predicated region fallthrough
CT: control target
= control target key end

     0   :  { %s131_s10 = smov 120   ;;  %s132_s11 = smov 104   ;;  %vm3_vm0 = vcmask 64512   ;;  %vm9_vm1 = vcmask 1048512   ;;  %vm15_vm2 = vcmask 982912   ;;  %vm21_vm3 = vcmask 917312   ;;  %s207_s0 = inlined_call_operand.vmem [shape: f32[16,8], index: 0, kind: input, shape index: {}]   ;;  %s208_s1 = inlined_call_operand.vmem [shape: f32[1,128], index: 1, kind: output, shape index: {}]  }
   0x1   :  { %v101_v0 = vld [vmem:[%s207_s0 + $0xf] sm:$0x1]   ;;  %v103_v1 = vld [vmem:[%s207_s0 + $0xd] sm:$0x1]   ;;  %v102_v2 = vld [vmem:[%s207_s0 + $0xe] sm:$0x1]  }
   0x2   :  { %7 = vrot.lane.b32.xlu0 %v101_v0, %s131_s10  ;;  %19 = vrot.lane.b32.xlu1 %v103_v1, %s132_s11  ;;  %v104_v3 = vld [vmem:[%s207_s0 + $0xc] sm:$0x1]   ;;  %s133_s16 = smov 112   ;;  %s134_s17 = smov 96   ;;  %v105_v4 = vld [vmem:[%s207_s0 + $0xb] sm:$0x1]  }
   0x3   :  { %v106_v5 = vld [vmem:[%s207_s0 + $0xa] sm:$0x1]   ;;  %v2_v6 = vld [vmem:[%s207_s0] sm:$0x1]   ;;  %s135_s24 = smov 88   ;;  %s136_s25 = smov 80  }
   0x4   :  { %4 = vst.msk [vmem:[#allocation0] sm:$0x1] %vm3_vm0, %v2_v6   ;;  %v107_v7 = vld [vmem:[%s207_s0 + $0x9] sm:$0x1]   ;;  %v108_v8 = vld [vmem:[%s207_s0 + $0x8] sm:$0x1]  }
   0x5   :  { %s137_s30 = smov 72   ;;  %s138_s2 = smov 64   ;;  %v109_v9 = vld [vmem:[%s207_s0 + $0x7] sm:$0x1]   ;;  %v110_v10 = vld [vmem:[%s207_s0 + $0x6] sm:$0x1]  }
   0x6   :  { %13 = vrot.lane.b32.xlu0 %v102_v2, %s133_s16  ;;  %25 = vrot.lane.b32.xlu1 %v104_v3, %s134_s17  ;;  %s139_s7 = smov 56   ;;  %s140_s8 = smov 48   ;;  %v111_v11 = vld [vmem:[%s207_s0 + $0x5] sm:$0x1]   ;;  %v112_v12 = vld [vmem:[%s207_s0 + $0x4] sm:$0x1]  }
   0x7   :  { %s141_s13 = smov 40   ;;  %s142_s14 = smov 32   ;;  %v113_v13 = vld [vmem:[%s207_s0 + $0x3] sm:$0x1]   ;;  %v114_v14 = vld [vmem:[%s207_s0 + $0x2] sm:$0x1]  }
   0x8   :  { %s143_s19 = smov 24   ;;  %s144_s20 = smov 16   ;;  %v115_v15 = vld [vmem:[%s207_s0 + $0x1] sm:$0x1]   ;;  %vm27_vm4 = vcmask 851712   ;;  %vm33_vm5 = vcmask 786112  }
   0x9   :  { %s145_s0 = smov 8   ;;  %vm39_vm6 = vcmask 720512   ;;  %vm45_vm7 = vcmask 654912   ;;  %vm51_vm8 = vcmask 589312   ;;  %vm57_vm9 = vcmask 523712  }
   0xa   :  { %31 = vrot.lane.b32.xlu0 %v105_v4, %s135_s24  ;;  %37 = vrot.lane.b32.xlu1 %v106_v5, %s136_s25  ;;  %vm63_vm10 = vcmask 458112   ;;  %vm69_vm11 = vcmask 392512   ;;  %vm75_vm12 = vcmask 326912   ;;  %vm81_vm13 = vcmask 261312  }
   0xb   :  { %vm87_vm14 = vcmask 195712   ;;  %vm93_vm15 = vcmask 130112  }
   0xe   :  { %43 = vrot.lane.b32.xlu0 %v107_v7, %s137_s30  ;;  %49 = vrot.lane.b32.xlu1 %v108_v8, %s138_s2 }
  0x12   :  { %55 = vrot.lane.b32.xlu0 %v109_v9, %s139_s7  ;;  %61 = vrot.lane.b32.xlu1 %v110_v10, %s140_s8 }
  0x16   :  { %67 = vrot.lane.b32.xlu0 %v111_v11, %s141_s13  ;;  %73 = vrot.lane.b32.xlu1 %v112_v12, %s142_s14 }
  0x1a   :  { %79 = vrot.lane.b32.xlu0 %v113_v13, %s143_s19  ;;  %85 = vrot.lane.b32.xlu1 %v114_v14, %s144_s20 }
  0x1e   :  { %91 = vrot.lane.b32.xlu0 %v115_v15, %s145_s0 }
  0x74   :  { %v8_v16 = vpop.permute.xlu0 %7   ;;  %v20_v17 = vpop.permute.xlu1 %19  }
  0x75   :  { %10 = vst.msk [vmem:[#allocation0] sm:$0x1] %vm9_vm1, %v8_v16  }
  0x78   :  { %v14_v18 = vpop.permute.xlu0 %13   ;;  %v26_v19 = vpop.permute.xlu1 %25  }
  0x79   :  { %16 = vst.msk [vmem:[#allocation0] sm:$0x1] %vm15_vm2, %v14_v18  }
  0x7a   :  { %22 = vst.msk [vmem:[#allocation0] sm:$0x1] %vm21_vm3, %v20_v17  }
  0x7b   :  { %28 = vst.msk [vmem:[#allocation0] sm:$0x1] %vm27_vm4, %v26_v19  }
  0x7c   :  { %v32_v20 = vpop.permute.xlu0 %31   ;;  %v38_v21 = vpop.permute.xlu1 %37  }
  0x7d   :  { %34 = vst.msk [vmem:[#allocation0] sm:$0x1] %vm33_vm5, %v32_v20  }
  0x7e   :  { %40 = vst.msk [vmem:[#allocation0] sm:$0x1] %vm39_vm6, %v38_v21  }
  0x80   :  { %v44_v22 = vpop.permute.xlu0 %43   ;;  %v50_v23 = vpop.permute.xlu1 %49  }
  0x81   :  { %46 = vst.msk [vmem:[#allocation0] sm:$0x1] %vm45_vm7, %v44_v22  }
  0x82   :  { %52 = vst.msk [vmem:[#allocation0] sm:$0x1] %vm51_vm8, %v50_v23  }
  0x84   :  { %v56_v24 = vpop.permute.xlu0 %55   ;;  %v62_v25 = vpop.permute.xlu1 %61  }
  0x85   :  { %58 = vst.msk [vmem:[#allocation0] sm:$0x1] %vm57_vm9, %v56_v24  }
  0x86   :  { %64 = vst.msk [vmem:[#allocation0] sm:$0x1] %vm63_vm10, %v62_v25  }
  0x88   :  { %v68_v26 = vpop.permute.xlu0 %67   ;;  %v74_v27 = vpop.permute.xlu1 %73  }
  0x89   :  { %70 = vst.msk [vmem:[#allocation0] sm:$0x1] %vm69_vm11, %v68_v26  }
  0x8a   :  { %76 = vst.msk [vmem:[#allocation0] sm:$0x1] %vm75_vm12, %v74_v27  }
  0x8c   :  { %v80_v28 = vpop.permute.xlu0 %79   ;;  %v86_v29 = vpop.permute.xlu1 %85  }
  0x8d   :  { %82 = vst.msk [vmem:[#allocation0] sm:$0x1] %vm81_vm13, %v80_v28  }
  0x8e   :  { %88 = vst.msk [vmem:[#allocation0] sm:$0x1] %vm87_vm14, %v86_v29  }
  0x90   :  { %v92_v30 = vpop.permute.xlu0 %91  }
  0x91   :  { %94 = vst.msk [vmem:[#allocation0] sm:$0x1] %vm93_vm15, %v92_v30  }
  0x98   :  { %v98_v31 = vld [vmem:[#allocation0] sm:$0x1] }
  0x99   :  { %100 = vst [vmem:[%s208_s1] sm:$0x1] %v98_v31 }

// kernel: basic_block_forward.1
= control target key start
LH: loop header
LB: loop body
LE: loop exit
PB: predicated region body
PF: predicated region fallthrough
CT: control target
= control target key end

     0   :  { %s1499_s24 = smov 0   ;;  %s1877_s0 = inlined_call_operand.vmem [shape: f32[4,16,64], index: 0, kind: input, shape index: {}]   ;;  %s1878_s1 = inlined_call_operand.vmem [shape: f32[1,64], index: 1, kind: input, shape index: {}]   ;;  %s1879_s2 = inlined_call_operand.vmem [shape: f32[1,64], index: 2, kind: input, shape index: {}]   ;;  %s1880_s3 = inlined_call_operand.vmem [shape: f32[1,128], index: 3, kind: input, shape index: {}]   ;;  %s1881_s4 = inlined_call_operand.vmem [shape: f32[1,128], index: 4, kind: input, shape index: {}]   ;;  %s1882_s5 = inlined_call_operand.vmem [shape: bf16[192,128], index: 5, kind: input, shape index: {}]   ;;  %s1883_s6 = inlined_call_operand.vmem [shape: bf16[448,128], index: 6, kind: input, shape index: {}]   ;;  %s1884_s7 = inlined_call_operand.vmem [shape: f32[4,16,128], index: 7, kind: output, shape index: {}]  }
   0x1 LB: > { %s1273_s25 = sadd.s32 4294967295, %s1455_s24   ;;  %p1277_p0 = scmp.ge.s32.totalorder %s1455_s24, 1  ;;  %s1455_s24 = sphi %s1499_s24, %s17_s24  }
   0x2   : > { %p239_p1 = scmp.lt.s32.totalorder %s1455_s24, 3 }
   0x4   : > { %p240_p2 = pnand %p1277_p0, %p239_p1 }
   0x5   : > { %s1278_s26 = sshll.u32 (!%p240_p2), %s1273_s25, 1  ;;  %vm320_vm0 = vcmask (!%p240_p2), 516096   ;;  %vm321_vm1 = vsmask.f32 (!%p240_p2), 256  ;;  %v323_v0 = vld [vmem:[#allocation2] sm:$0x1] (!%p240_p2) }
   0x6   : > { %243 = sbr.rel (%p240_p2) target bundleno = 691 (0x2b3), region = 48  ;;  %p274_p3 = scmp.lt.s32.totalorder (!%p240_p2), %s1278_s26, 3  ;;  %vm1508_vm2 = vmand (!%p240_p2), %vm320_vm0, %vm321_vm1  ;;  %v326_v2 = vld [vmem:[#allocation2 + $0xc] sm:$0x1] (!%p240_p2)  ;;  %vm329_vm3 = vsmask.f32 (!%p240_p2), 7938 }
   0x7   : > { %v331_v3 = vld [vmem:[#allocation2 + $0x8] sm:$0x1] (!%p240_p2)  ;;  %v324_v4 = vsel (!%p240_p2), %vm1508_vm2, 0, %v323_v0  ;;  %v327_v5 = vsel (!%p240_p2), %vm1508_vm2, 0, %v326_v2  ;;  %vm1519_vm4 = vmand (!%p240_p2), %vm320_vm0, %vm329_vm3  ;;  %v1284_v7 = vld [vmem:[%s1878_s1] ss:$0 sm:$0xff] (!%p240_p2) }
   0x8   : > { %325 = vst [vmem:[#allocation2] sm:$0x1] (!%p240_p2), %v324_v4  ;;  %328 = vst [vmem:[#allocation2 + $0xc] sm:$0x1] (!%p240_p2), %v327_v5  ;;  %v332_v8 = vsel (!%p240_p2), %vm1519_vm4, 0, %v331_v3  ;;  %v1457_v9 = vmov (!%p240_p2), 0  }
   0x9   : > { %623 = vmatprep.subr.bf16.mxu0 (!%p240_p2), %v1457_v9  ;;  %333 = vst [vmem:[#allocation2 + $0x8] sm:$0x1] (!%p240_p2), %v332_v8  ;;  %v334_v10 = vld [vmem:[#allocation2 + $0x14] sm:$0x1] (!%p240_p2)  ;;  %v1285_v11 = vld [vmem:[%s1879_s2] ss:$0 sm:$0xff] (!%p240_p2) }
   0xa   : > { %v335_v12 = vsel (!%p240_p2), %vm1519_vm4, 0, %v334_v10  ;;  %v1406_v13 = vld [vmem:[%s1882_s5] sm:$0xff] (!%p240_p2)   ;;  %v1407_v22 = vld [vmem:[%s1882_s5 + $0x8] sm:$0xff] (!%p240_p2)   ;;  %v1408_v30 = vld [vmem:[%s1882_s5 + $0x10] sm:$0xff] (!%p240_p2)   ;;  %vm347_vm5 = vsmask.f32 (!%p240_p2), 4368 }
   0xb   : > { %336 = vst [vmem:[#allocation2 + $0x14] sm:$0x1] (!%p240_p2), %v335_v12  ;;  %624 = vmatpush1.bf16.msra.mxu0 (!%p240_p2), %v1406_v13  ;;  %vm389_vm6 = vcmask (!%p240_p2), 519168   ;;  %v1409_v36 = vld [vmem:[%s1882_s5 + $0x18] sm:$0xff] (!%p240_p2)   ;;  %vm1573_vm7 = vmor (!%p240_p2), %vm321_vm1, %vm347_vm5  ;;  %v1410_v51 = vld [vmem:[%s1882_s5 + $0x20] sm:$0xff] (!%p240_p2)   ;;  %vm471_vm11 = vcmask (!%p240_p2), 1042432  }
   0xc   : > { %625 = vmatprep.subr.bf16.mxu0 (!%p240_p2), %v1457_v9  ;;  %vm1582_vm8 = vmand (!%p240_p2), %vm389_vm6, %vm329_vm3  ;;  %vm412_vm9 = vsmask.f32 (!%p240_p2), 3328  ;;  %vm413_vm10 = vsmask.f32 (!%p240_p2), 7440  ;;  %v1412_v8 = vld [vmem:[%s1882_s5 + $0x30] sm:$0xff] (!%p240_p2)   ;;  %vm472_vm12 = vcmask (!%p240_p2), 1046532  }
   0xd   : > { %s1904_s26 = smov (!%p274_p3, %s1278_s26), 3  ;;  %v1413_v12 = vld [vmem:[%s1882_s5 + $0x38] sm:$0xff]   ;;  %vm512_vm13 = vcmask 523264   ;;  %vm1639_vm14 = vmor %vm412_vm9, %vm413_vm10  ;;  %s1458_s12 = smov 64   ;;  %vm700_vm0 = vcmask 1040384  }
   0xe   : > { %s1358_s29 = sshll.u32 %s1904_s26, 4  ;;  %vm1646_vm15 = vmor %vm471_vm11, %vm472_vm12 }
   0xf   : > { %s278_s9 = scalar_lea.vmem %s1877_s0, %s1358_s29  ;;  %626 = vmatpush1.bf16.msra.mxu0 %v1407_v22  ;;  %v391_v43 = vld [vmem:[#allocation2] sm:$0xf]  ;;  %v399_v50 = vld [vmem:[#allocation2 + $0xc] sm:$0xf]  ;;  %vm1704_vm4 = vmand %vm700_vm0, %vm329_vm3  ;;  %s285_s19 = scalar_lea.vmem %s1884_s7, %s1358_s29 }
  0x10   : > { %v288_v14 = vld [vmem:[%s278_s9] sm:$0xff]  ;;  %v289_v15 = vld [vmem:[%s278_s9 + $0x8] sm:$0xff]  ;;  %v290_v16 = vld [vmem:[%s278_s9 + $0x10] sm:$0xff]  ;;  %627 = vmatprep.subr.bf16.mxu0 %v1457_v9 }
  0x11   : > { %v299_v17 = vmul.f32 %v1284_v7, %v288_v14  ;;  %v300_v18 = vmul.f32 %v1284_v7, %v289_v15  ;;  %v301_v19 = vmul.f32 %v1284_v7, %v290_v16  ;;  %v291_v20 = vld [vmem:[%s278_s9 + $0x18] sm:$0xff]  ;;  %v396_v44 = vld [vmem:[#allocation2 + $0x8] sm:$0x1] }
  0x12   : > { %v302_v21 = vmul.f32 %v1284_v7, %v291_v20  ;;  %v403_v59 = vld [vmem:[#allocation2 + $0x14] sm:$0x1]  ;;  %v1411_v7 = vld [vmem:[%s1882_s5 + $0x28] sm:$0xff]  }
  0x13   : > { %v310_v23 = vadd.f32 %v1285_v11, %v299_v17  ;;  %v311_v24 = vadd.f32 %v1285_v11, %v300_v18  ;;  %v312_v25 = vadd.f32 %v1285_v11, %v301_v19  ;;  %628 = vmatpush1.bf16.msra.mxu0 %v1408_v30 }
  0x14   : > { %v313_v26 = vadd.f32 %v1285_v11, %v302_v21  ;;  %629 = vmatprep.subr.bf16.mxu0 %v1457_v9 }
  0x15   : > { %v1547_v27 = vmax.f32 %v310_v23, 0.0  ;;  %v1549_v28 = vmax.f32 %v311_v24, 0.0  ;;  %v1551_v29 = vmax.f32 %v312_v25, 0.0 }
  0x16   : > { %v1556_v31 = vmax.f32 %v313_v26, 0.0 }
  0x17   : > { %v1360_v32 = vpack.c.bf16 %v1547_v27, %v1547_v27  ;;  %v1361_v33 = vpack.c.bf16 %v1549_v28, %v1549_v28  ;;  %v1362_v34 = vpack.c.bf16 %v1551_v29, %v1551_v29  ;;  %630 = vmatpush1.bf16.msra.mxu0 %v1409_v36  ;;  %v1414_v36 = vld [vmem:[%s1882_s5 + $0x40] sm:$0xff]  }
  0x18   : > { %v1363_v35 = vpack.c.bf16 %v1556_v31, %v1556_v31  ;;  %631 = vmatprep.subr.bf16.mxu0 %v1457_v9 }
  0x19   : > { %v350_v37 = vshrl.u32 %v1360_v32, 16  ;;  %v353_v38 = vshll.u32 %v1360_v32, 16  ;;  %v358_v39 = vshrl.u32 %v1361_v33, 16  ;;  %v361_v40 = vshll.u32 %v1361_v33, 16 }
  0x1a   : > { %v367_v41 = vshrl.u32 %v1362_v34, 16  ;;  %v370_v42 = vshll.u32 %v1362_v34, 16  ;;  %v375_v45 = vshrl.u32 %v1363_v35, 16  ;;  %v378_v46 = vshll.u32 %v1363_v35, 16 }
  0x1b   : > { %v352_v48 = vrot.slane %v350_v37, 7  ;;  %v360_v49 = vrot.slane %v358_v39, 7  ;;  %632 = vmatpush1.bf16.msra.mxu0 %v1410_v51 }
  0x1c   : > { %v369_v52 = vrot.slane %v367_v41, 7  ;;  %v377_v54 = vrot.slane %v375_v45, 7  ;;  %633 = vmatprep.subr.bf16.mxu0 %v1457_v9 }
  0x1d   : > { %v355_v55 = vor.u32 %v353_v38, %v352_v48  ;;  %v356_v56 = vrot.slane %v352_v48, 4  ;;  %v363_v57 = vor.u32 %v361_v40, %v360_v49  ;;  %v365_v58 = vrot.slane %v360_v49, 4 }
  0x1e   : > { %v372_v60 = vor.u32 %v370_v42, %v369_v52  ;;  %v373_v61 = vrot.slane %v369_v52, 4  ;;  %v380_v62 = vor.u32 %v378_v46, %v377_v54  ;;  %v382_v63 = vrot.slane %v377_v54, 4  ;;  %v1439_v42 = vld [vmem:[%s1883_s6 + $0x98] sm:$0xff]  }
  0x1f   : > { %v364_v0 = vsel %vm1573_vm7, %v356_v56, %v363_v57  ;;  %v392_v2 = vsel %vm1582_vm8, %v355_v55, %v391_v43  ;;  %v397_v3 = vsel %vm1508_vm2, %v365_v58, %v396_v44  ;;  %634 = vmatpush1.bf16.msra.mxu0 %v1411_v7 }
  0x20   : > { %393 = vst [vmem:[#allocation2] sm:$0xf] %v392_v2  ;;  %395 = vst.msk [vmem:[#allocation2 + $0x4] sm:$0xf] %vm389_vm6, %v364_v0  ;;  %v400_v4 = vsel %vm1582_vm8, %v372_v60, %v399_v50  ;;  %v381_v5 = vsel %vm1573_vm7, %v373_v61, %v380_v62  ;;  %v404_v6 = vsel %vm1508_vm2, %v382_v63, %v403_v59  ;;  %635 = vmatprep.subr.bf16.mxu0 %v1457_v9  ;;  %v1415_v60 = vld [vmem:[%s1882_s5 + $0x48] sm:$0xff]  }
  0x21   : > { %398 = vst [vmem:[#allocation2 + $0x8] sm:$0x1] %v397_v3  ;;  %401 = vst [vmem:[#allocation2 + $0xc] sm:$0xf] %v400_v4 }
  0x22   : > { %402 = vst.msk [vmem:[#allocation2 + $0x10] sm:$0xf] %vm389_vm6, %v381_v5  ;;  %405 = vst [vmem:[#allocation2 + $0x14] sm:$0x1] %v404_v6 }
  0x23   : > { %636 = vmatpush1.bf16.msra.mxu0 %v1412_v8  ;;  %v1416_v8 = vld [vmem:[%s1882_s5 + $0x50] sm:$0xff]   ;;  %vm1697_vm2 = vmand %vm700_vm0, %vm321_vm1  ;;  %vm765_vm1 = vcmask 1043456  }
  0x24   : > { %637 = vmatprep.subr.bf16.mxu0 %v1457_v9  ;;  %vm1764_vm5 = vmand %vm765_vm1, %vm329_vm3 }
  0x27   : > { %v1609_v1 = vld [vmem:[#allocation2] sm:$0xf]  ;;  %v1611_v10 = vld [vmem:[#allocation2 + $0x4] sm:$0xf]  ;;  %638 = vmatpush1.bf16.msra.mxu0 %v1413_v12 }
  0x28   : > { %v1613_v11 = vld [vmem:[#allocation2 + $0x8] sm:$0x1]  ;;  %v416_v13 = vshrl.u32 %v1609_v1, 16  ;;  %v419_v14 = vshll.u32 %v1609_v1, 16  ;;  %v425_v15 = vshll.u32 %v1611_v10, 16  ;;  %v429_v16 = vshrl.u32 %v1611_v10, 16  ;;  %639 = vmatprep.subr.bf16.mxu0 %v1457_v9 }
  0x29   : > { %v1622_v17 = vld [vmem:[#allocation2 + $0xc] sm:$0xf]  ;;  %v435_v18 = vshll.u32 %v1613_v11, 16  ;;  %v1625_v19 = vld [vmem:[#allocation2 + $0x10] sm:$0xf]  ;;  %v1292_v22 = vcombine.low %v1609_v1, %v1611_v10  ;;  %v476_v54 = vrot.slane %v1611_v10, 5 }
  0x2a   : > { %v411_v20 = vld [vmem:[#allocation2 + $0x14] sm:$0x1]  ;;  %v440_v21 = vshrl.u32 %v1622_v17, 16  ;;  %v418_v23 = vrot.slane %v416_v13, 4  ;;  %v421_v24 = vrot.slane %v419_v14, 5  ;;  %v427_v25 = vrot.slane %v425_v15, 5 }
  0x2b   : > { %v431_v26 = vrot.slane %v429_v16, 4  ;;  %v463_v30 = vld [vmem:[#allocation2] sm:$0xe]  ;;  %v437_v32 = vrot.slane %v435_v18, 5  ;;  %v443_v34 = vshll.u32 %v1622_v17, 16  ;;  %v449_v35 = vshll.u32 %v1625_v19, 16  ;;  %640 = vmatpush1.bf16.msra.mxu0 %v1414_v36 }
  0x2c   : > { %v442_v33 = vrot.slane %v440_v21, 4  ;;  %v464_v37 = vld [vmem:[#allocation2 + $0xc] sm:$0xe]  ;;  %v422_v38 = vor.u32 %v421_v24, %v418_v23  ;;  %v453_v40 = vshrl.u32 %v1625_v19, 16  ;;  %v459_v41 = vshll.u32 %v411_v20, 16  ;;  %641 = vmatprep.subr.bf16.mxu0 %v1457_v9  ;;  %v1419_v23 = vld [vmem:[%s1883_s6 + $0x40] sm:$0xff]  }
  0x2d   : > { %v432_v39 = vor.u32 %v431_v26, %v427_v25  ;;  %v445_v43 = vrot.slane %v443_v34, 5  ;;  %v451_v44 = vrot.slane %v449_v35, 5  ;;  %v486_v45 = vrot.slane %v411_v20, 5  ;;  %v1420_v24 = vld [vmem:[%s1883_s6] sm:$0xff]   ;;  %v702_v10 = vld [vmem:[#allocation3] sm:$0x1]  ;;  %1368 = vmatprep.subr.bf16.mxu1 %v1419_v23 }
  0x2e   : > { %v1290_v46 = vrot.slane %v463_v30, 9  ;;  %v423_v48 = vrot.slane %v422_v38, 4  ;;  %v455_v50 = vrot.slane %v453_v40, 4  ;;  %v461_v51 = vrot.slane %v459_v41, 5  ;;  %1369 = vmatpush3.bf16.msra.mxu1 %v1420_v24  ;;  %v709_v26 = vld [vmem:[#allocation3 + $0x8] sm:$0x1] }
  0x2f   : > { %v433_v49 = vrot.slane %v432_v39, 4  ;;  %v446_v53 = vor.u32 %v445_v43, %v442_v33  ;;  %v479_v55 = vrot.slane %v1613_v11, 5  ;;  %v1291_v56 = vrot.slane %v464_v37, 9  ;;  %642 = vmatpush1.bf16.msra.mxu0 %v1415_v60  ;;  %v1421_v30 = vld [vmem:[%s1883_s6 + $0x48] sm:$0xff]   ;;  %v1423_v34 = vld [vmem:[%s1883_s6 + $0x50] sm:$0xff]   ;;  %v1425_v36 = vld [vmem:[%s1883_s6 + $0x58] sm:$0xff]  }
  0x30   : > { %v428_v57 = vsel %vm1639_vm14, %v423_v48, %v427_v25  ;;  %v456_v59 = vor.u32 %v455_v50, %v451_v44  ;;  %v483_v61 = vrot.slane %v1625_v19, 5  ;;  %v477_v0 = vsel %vm1646_vm15, %v1290_v46, %v476_v54  ;;  %643 = vmatprep.subr.bf16.mxu0 %v1457_v9  ;;  %v1422_v33 = vld [vmem:[%s1883_s6 + $0x8] sm:$0xff]   ;;  %1370 = vmatprep.subr.bf16.mxu1 %v1421_v30  ;;  %v1424_v35 = vld [vmem:[%s1883_s6 + $0x10] sm:$0xff]   ;;  %v1426_v37 = vld [vmem:[%s1883_s6 + $0x18] sm:$0xff]  }
  0x31   : > { %v438_v58 = vsel %vm1639_vm14, %v433_v49, %v437_v32  ;;  %v447_v63 = vrot.slane %v446_v53, 4  ;;  %v478_v2 = vrot.slane %v476_v54, 4  ;;  %v1293_v6 = vcombine.low %v1622_v17, %v1625_v19  ;;  %v1417_v17 = vld [vmem:[%s1882_s5 + $0x58] sm:$0xff]   ;;  %v1427_v38 = vld [vmem:[%s1883_s6 + $0x60] sm:$0xff]   ;;  %v1429_v43 = vld [vmem:[%s1883_s6 + $0x68] sm:$0xff]  }
  0x32   : > { %v1294_v62 = vcombine.low %v428_v57, %v438_v58  ;;  %v457_v3 = vrot.slane %v456_v59, 4  ;;  %v484_v4 = vsel %vm1646_vm15, %v1291_v56, %v483_v61  ;;  %v485_v5 = vrot.slane %v483_v61, 4  ;;  %1371 = vmatpush3.bf16.msra.mxu1 %v1422_v33  ;;  %v705_v39 = vld [vmem:[#allocation3 + $0xc] sm:$0x1]  ;;  %v1431_v48 = vld [vmem:[%s1883_s6 + $0x70] sm:$0xff]   ;;  %v1433_v50 = vld [vmem:[%s1883_s6 + $0x78] sm:$0xff]  }
  0x33   : > { %v452_v7 = vsel %vm1639_vm14, %v447_v63, %v451_v44  ;;  %v480_v11 = vsel %vm1646_vm15, %v478_v2, %v479_v55  ;;  %644 = vmatpush1.bf16.msra.mxu0 %v1416_v8  ;;  %v710_v32 = vsel %vm1704_vm4, 0, %v709_v26  ;;  %1372 = vmatprep.subr.bf16.mxu1 %v1423_v34  ;;  %v706_v40 = vsel %vm1697_vm2, 0, %v705_v39  ;;  %v1428_v41 = vld [vmem:[%s1883_s6 + $0x20] sm:$0xff]   ;;  %v712_v44 = vld [vmem:[#allocation3 + $0x14] sm:$0x1]  ;;  %v1432_v49 = vld [vmem:[%s1883_s6 + $0x30] sm:$0xff]  }
  0x34   : > { %502 = vrot.lane.b32.xlu0 %v1294_v62, %s1458_s12  ;;  %v462_v12 = vsel %vm1639_vm14, %v457_v3, %v461_v51  ;;  %v1296_v13 = vcombine.low %v477_v0, %v480_v11  ;;  %v487_v14 = vsel %vm1646_vm15, %v485_v5, %v486_v45  ;;  %645 = vmatprep.subr.bf16.mxu0 %v1457_v9  ;;  %v1430_v45 = vld [vmem:[%s1883_s6 + $0x28] sm:$0xff]   ;;  %v713_v46 = vsel %vm1704_vm4, 0, %v712_v44  ;;  %v1434_v51 = vld [vmem:[%s1883_s6 + $0x38] sm:$0xff]   ;;  %v1312_v53 = vld [vmem:[%s1880_s3] ss:$0 sm:$0xff] }
  0x35   : > { %v1295_v15 = vcombine.low %v452_v7, %v462_v12  ;;  %v1297_v16 = vcombine.low %v484_v4, %v487_v14  ;;  %711 = vst [vmem:[#allocation3 + $0x8] sm:$0x1] %v710_v32  ;;  %707 = vst [vmem:[#allocation3 + $0xc] sm:$0x1] %v706_v40  ;;  %v1313_v55 = vld [vmem:[%s1881_s4] ss:$0 sm:$0xff] }
  0x36   : > { %1310 = vmatprep.mubr.msk.bf16.mxu0 %vm512_vm13, %v1296_v13  ;;  %1373 = vmatpush3.bf16.msra.mxu1 %v1424_v35  ;;  %714 = vst [vmem:[#allocation3 + $0x14] sm:$0x1] %v713_v46 }
  0x37   : > { %646 = vmatpush1.bf16.msra.mxu0 %v1417_v17  ;;  %1374 = vmatprep.subr.bf16.mxu1 %v1425_v36 }
  0x38   : > { %504 = vrot.lane.b32.xlu0 %v1295_v15, %s1458_s12 }
  0x3a   : > { %1375 = vmatpush3.bf16.msra.mxu1 %v1426_v37 }
  0x3b   : > { %1376 = vmatprep.subr.bf16.mxu1 %v1427_v38 }
  0x3c   : > { %v774_v40 = vld [vmem:[#allocation3 + $0xc] sm:$0xf] }
  0x3e   : > { %1377 = vmatpush3.bf16.msra.mxu1 %v1428_v41 }
  0x3f   : > { %1378 = vmatprep.subr.bf16.mxu1 %v1429_v43 }
  0x42   : > { %1379 = vmatpush3.bf16.msra.mxu1 %v1430_v45 }
  0x43   : > { %1380 = vmatprep.subr.bf16.mxu1 %v1431_v48 }
  0x46   : > { %1381 = vmatpush3.bf16.msra.mxu1 %v1432_v49  ;;  %v778_v49 = vld [vmem:[#allocation3 + $0x14] sm:$0x1] }
  0x47   : > { %1382 = vmatprep.subr.bf16.mxu1 %v1433_v50 }
  0x4a   : > { %1383 = vmatpush3.bf16.msra.mxu1 %v1434_v51 }
  0x4b   : > { %1162 = vmatprep.subr.bf16.mxu1 %v1457_v9 }
  0xa6   : > { %v503_v18 = vpop.permute.xlu0 %502 }
  0xa7   : > { %v515_v19 = vsel %vm512_vm13, %v1292_v22, %v503_v18  ;;  %v703_v22 = vsel %vm1697_vm2, 0, %v702_v10  ;;  %v771_v10 = vld [vmem:[#allocation3 + $0x8] sm:$0x1] }
  0xa8   : > { %656 = vmatmul.mubr.bf16.vlgmr.msra.gmra.mrb[0].mxu0 %v515_v19  ;;  %704 = vst [vmem:[#allocation3] sm:$0x1] %v703_v22 }
  0xa9   : > { %1311 = vmatprep.mubr.msk.bf16.mxu0 %vm512_vm13, %v1297_v16 }
  0xaa   : > { %v505_v20 = vpop.permute.xlu0 %504 }
  0xab   : > { %v519_v21 = vsel %vm512_vm13, %v1293_v6, %v505_v20 }
  0xaf   : > { %v767_v17 = vld [vmem:[#allocation3] sm:$0xf] }
  0xb0   : > { %664 = vmatmul.mubr.bf16.gmra.mrb[4].mxu0 %v519_v21 }
 0x17b   : > { %v657_v54 = vpop.f32.mrb[0].mxu0 }
 0x17c   : > { %v679_v56 = vmul.f32 %v1312_v53, %v657_v54  ;;  %v659_v57 = vpop.f32.mrb[1].mxu0 }
 0x17d   : > { %v660_v58 = vpop.f32.mrb[2].mxu0 }
 0x17e   : > { %v690_v59 = vadd.f32 %v1313_v55, %v679_v56  ;;  %v680_v60 = vmul.f32 %v1312_v53, %v660_v58  ;;  %v662_v61 = vpop.f32.mrb[3].mxu0 }
 0x180   : > { %v694_v62 = vmax.f32 %v690_v59, 0.0  ;;  %v691_v63 = vadd.f32 %v1313_v55, %v680_v60 }
 0x182   : > { %v1364_v0 = vpack.c.bf16 %v694_v62, %v694_v62  ;;  %v695_v2 = vmax.f32 %v691_v63, 0.0 }
 0x183   : > { %v665_v3 = vpop.f32.mrb[4].mxu0 }
 0x184   : > { %v726_v4 = vshrl.u32 %v1364_v0, 16  ;;  %v1365_v5 = vpack.c.bf16 %v695_v2, %v695_v2  ;;  %v681_v6 = vmul.f32 %v1312_v53, %v665_v3  ;;  %v667_v7 = vpop.f32.mrb[5].mxu0  ;;  %v729_v12 = vshll.u32 %v1364_v0, 16 }
 0x185   : > { %v668_v8 = vpop.f32.mrb[6].mxu0 }
 0x186   : > { %v728_v11 = vrot.slane %v726_v4, 7  ;;  %v734_v13 = vshrl.u32 %v1365_v5, 16  ;;  %v692_v14 = vadd.f32 %v1313_v55, %v681_v6  ;;  %v670_v15 = vpop.f32.mrb[7].mxu0  ;;  %v682_v18 = vmul.f32 %v1312_v53, %v668_v8 }
 0x187   : > { %v737_v21 = vshll.u32 %v1365_v5, 16 }
 0x188   : > { %v731_v19 = vor.u32 %v729_v12, %v728_v11  ;;  %v736_v20 = vrot.slane %v734_v13, 7  ;;  %v696_v23 = vmax.f32 %v692_v14, 0.0  ;;  %v732_v24 = vrot.slane %v728_v11, 4 }
 0x189   : > { %v693_v22 = vadd.f32 %v1313_v55, %v682_v18 }
 0x18a   : > { %v768_v25 = vsel %vm1764_vm5, %v731_v19, %v767_v17  ;;  %v739_v26 = vor.u32 %v737_v21, %v736_v20  ;;  %v741_v30 = vrot.slane %v736_v20, 4  ;;  %v1366_v32 = vpack.c.bf16 %v696_v23, %v696_v23  ;;  %v1436_v23 = vld [vmem:[%s1883_s6 + $0x80] sm:$0xff]  }
 0x18b   : > { %769 = vst [vmem:[#allocation3] sm:$0xf] %v768_v25  ;;  %v697_v33 = vmax.f32 %v693_v22, 0.0 }
 0x18c   : > { %v740_v34 = vsel %vm1573_vm7, %v732_v24, %v739_v26  ;;  %v772_v35 = vsel %vm1697_vm2, %v741_v30, %v771_v10  ;;  %v743_v36 = vshrl.u32 %v1366_v32, 16  ;;  %v746_v37 = vshll.u32 %v1366_v32, 16 }
 0x18d   : > { %770 = vst [vmem:[#allocation3 + $0x4] sm:$0xf] %v740_v34  ;;  %773 = vst [vmem:[#allocation3 + $0x8] sm:$0x1] %v772_v35  ;;  %v1367_v38 = vpack.c.bf16 %v697_v33, %v697_v33  ;;  %v1437_v33 = vld [vmem:[%s1883_s6 + $0x88] sm:$0xff]  }
 0x18e   : > { %v745_v39 = vrot.slane %v743_v36, 7 }
 0x18f   : > { %v751_v41 = vshrl.u32 %v1367_v38, 16  ;;  %v754_v43 = vshll.u32 %v1367_v38, 16  ;;  %v1438_v38 = vld [vmem:[%s1883_s6 + $0x90] sm:$0xff]  }
 0x190   : > { %v748_v44 = vor.u32 %v746_v37, %v745_v39  ;;  %v749_v45 = vrot.slane %v745_v39, 4 }
 0x191   : > { %v753_v46 = vrot.slane %v751_v41, 7  ;;  %v1440_v41 = vld [vmem:[%s1883_s6 + $0xa0] sm:$0xff]  }
 0x192   : > { %v775_v48 = vsel %vm1764_vm5, %v748_v44, %v774_v40  ;;  %v781_v50 = vld [vmem:[#allocation3] sm:$0xf]  ;;  %v318_v40 = vpack.c.bf16 %v1549_v28, %v1547_v27  ;;  %v1441_v27 = vld [vmem:[%s1883_s6 + $0xa8] sm:$0xff]   ;;  %v1443_v28 = vld [vmem:[%s1883_s6 + $0xb0] sm:$0xff]  }
 0x193   : > { %776 = vst [vmem:[#allocation3 + $0xc] sm:$0xf] %v775_v48  ;;  %v756_v51 = vor.u32 %v754_v43, %v753_v46  ;;  %v758_v53 = vrot.slane %v753_v46, 4  ;;  %v788_v54 = vshrl.u32 %v781_v50, 16  ;;  %v791_v55 = vshll.u32 %v781_v50, 16  ;;  %v1444_v43 = vld [vmem:[%s1883_s6 + $0xb8] sm:$0xff]  }
 0x194   : > { %v1776_v56 = vld [vmem:[#allocation3 + $0x4] sm:$0xf]  ;;  %v1782_v59 = vld [vmem:[#allocation3 + $0x8] sm:$0x1]  ;;  %v1447_v48 = vld [vmem:[%s1883_s6 + $0xd0] sm:$0xff]  }
 0x195   : > { %v757_v57 = vsel %vm1573_vm7, %v749_v45, %v756_v51  ;;  %v779_v58 = vsel %vm1697_vm2, %v758_v53, %v778_v49  ;;  %v790_v60 = vrot.slane %v788_v54, 4  ;;  %v793_v61 = vrot.slane %v791_v55, 5  ;;  %v1445_v44 = vld [vmem:[%s1883_s6 + $0xc0] sm:$0xff]   ;;  %v1446_v45 = vld [vmem:[%s1883_s6 + $0xc8] sm:$0xff]   ;;  %v1448_v53 = vld [vmem:[%s1883_s6 + $0xd8] sm:$0xff]  }
 0x196   : > { %777 = vst [vmem:[#allocation3 + $0x10] sm:$0xf] %v757_v57  ;;  %780 = vst [vmem:[#allocation3 + $0x14] sm:$0x1] %v779_v58  ;;  %v797_v62 = vshll.u32 %v1776_v56, 16  ;;  %v801_v63 = vshrl.u32 %v1776_v56, 16  ;;  %v1320_v10 = vcombine.low %v781_v50, %v1776_v56 }
 0x197   : > { %v794_v0 = vor.u32 %v793_v61, %v790_v60  ;;  %v807_v4 = vshll.u32 %v1782_v59, 16  ;;  %v845_v46 = vrot.slane %v1776_v56, 5  ;;  %v835_v50 = vld [vmem:[#allocation3] sm:$0xe]  ;;  %v848_v51 = vrot.slane %v1782_v59, 5 }
 0x198   : > { %v799_v2 = vrot.slane %v797_v62, 5  ;;  %v803_v3 = vrot.slane %v801_v63, 4  ;;  %v1318_v55 = vrot.slane %v835_v50, 9  ;;  %v319_v59 = vpack.c.bf16 %v1556_v31, %v1551_v29 }
 0x199   : > { %v795_v47 = vrot.slane %v794_v0, 4  ;;  %v809_v11 = vrot.slane %v807_v4, 5  ;;  %v847_v49 = vrot.slane %v845_v46, 4 }
 0x19a   : > { %v804_v5 = vor.u32 %v803_v3, %v799_v2  ;;  %v783_v6 = vld [vmem:[#allocation3 + $0xc] sm:$0xf]  ;;  %v846_v58 = vsel %vm1646_vm15, %v1318_v55, %v845_v46 }
 0x19b   : > { %v812_v1 = vshrl.u32 %v783_v6, 16  ;;  %v815_v7 = vshll.u32 %v783_v6, 16  ;;  %v800_v12 = vsel %vm1639_vm14, %v795_v47, %v799_v2  ;;  %v849_v54 = vsel %vm1646_vm15, %v847_v49, %v848_v51  ;;  %v836_v57 = vld [vmem:[#allocation3 + $0xc] sm:$0xe] }
 0x19c   : > { %v805_v8 = vrot.slane %v804_v5, 4  ;;  %v1324_v60 = vcombine.low %v846_v58, %v849_v54  ;;  %v1319_v61 = vrot.slane %v836_v57, 9 }
 0x19d   : > { %v1789_v13 = vld [vmem:[#allocation3 + $0x10] sm:$0xf]  ;;  %v1791_v14 = vld [vmem:[#allocation3 + $0x14] sm:$0x1]  ;;  %v814_v15 = vrot.slane %v812_v1, 4  ;;  %v817_v16 = vrot.slane %v815_v7, 5 }
 0x19e   : > { %v810_v17 = vsel %vm1639_vm14, %v805_v8, %v809_v11  ;;  %v821_v18 = vshll.u32 %v1789_v13, 16  ;;  %v825_v19 = vshrl.u32 %v1789_v13, 16  ;;  %v831_v20 = vshll.u32 %v1791_v14, 16 }
 0x19f   : > { %v1322_v21 = vcombine.low %v800_v12, %v810_v17  ;;  %v818_v24 = vor.u32 %v817_v16, %v814_v15  ;;  %v1321_v37 = vcombine.low %v783_v6, %v1789_v13  ;;  %v852_v56 = vrot.slane %v1789_v13, 5 }
 0x1a0   : > { %v823_v22 = vrot.slane %v821_v18, 5  ;;  %v827_v25 = vrot.slane %v825_v19, 4  ;;  %v833_v32 = vrot.slane %v831_v20, 5  ;;  %v855_v63 = vrot.slane %v1791_v14, 5 }
 0x1a1   : > { %1145 = vmatprep.mubr.bf16.mxu1 %v1322_v21  ;;  %v819_v26 = vrot.slane %v818_v24, 4  ;;  %v854_v62 = vrot.slane %v852_v56, 4 }
 0x1a2   : > { %1146 = vmatmul.mubr.bf16.vlgmr.msra.gmra.mrb[0].mxu1 %v1320_v10  ;;  %v828_v30 = vor.u32 %v827_v25, %v823_v22 }
 0x1a3   : > { %1163 = vmatpush1.bf16.msra.mxu1 %v1436_v23  ;;  %v824_v34 = vsel %vm1639_vm14, %v819_v26, %v823_v22  ;;  %v856_v0 = vsel %vm1646_vm15, %v854_v62, %v855_v63 }
 0x1a4   : > { %1164 = vmatprep.subr.bf16.mxu1 %v1457_v9  ;;  %v829_v35 = vrot.slane %v828_v30, 4 }
 0x1a6   : > { %v834_v36 = vsel %vm1639_vm14, %v829_v35, %v833_v32 }
 0x1a7   : > { %1165 = vmatpush1.bf16.msra.mxu1 %v1437_v33  ;;  %v1323_v39 = vcombine.low %v824_v34, %v834_v36 }
 0x1a8   : > { %1166 = vmatprep.subr.bf16.mxu1 %v1457_v9 }
 0x1a9   : > { %1153 = vmatprep.mubr.bf16.mxu1 %v1323_v39 }
 0x1aa   : > { %1154 = vmatmul.mubr.bf16.gmra.mrb[4].mxu1 %v1321_v37 }
 0x1ab   : > { %1167 = vmatpush1.bf16.msra.mxu1 %v1438_v38  ;;  %1354 = vmatprep.mubr.msk.bf16.mxu1 %vm512_vm13, %v318_v40 }
 0x1ac   : > { %1168 = vmatprep.subr.bf16.mxu1 %v1457_v9 }
 0x1af   : > { %1169 = vmatpush1.bf16.msra.mxu1 %v1439_v42 }
 0x1b0   : > { %1170 = vmatprep.subr.bf16.mxu1 %v1457_v9 }
 0x1b3   : > { %1171 = vmatpush1.bf16.msra.mxu1 %v1440_v41 }
 0x1b4   : > { %1172 = vmatprep.subr.bf16.mxu1 %v1457_v9 }
 0x1b7   : > { %1173 = vmatpush1.bf16.msra.mxu1 %v1441_v27 }
 0x1b8   : > { %1174 = vmatprep.subr.bf16.mxu1 %v1457_v9 }
 0x1bb   : > { %1175 = vmatpush1.bf16.msra.mxu1 %v1443_v28 }
 0x1bc   : > { %1176 = vmatprep.subr.bf16.mxu1 %v1457_v9 }
 0x1bf   : > { %1177 = vmatpush1.bf16.msra.mxu1 %v1444_v43 }
 0x1c0   : > { %1178 = vmatprep.subr.bf16.mxu1 %v1457_v9 }
 0x1c3   : > { %1179 = vmatpush1.bf16.msra.mxu1 %v1445_v44 }
 0x1c4   : > { %1180 = vmatprep.subr.bf16.mxu1 %v1457_v9 }
 0x1c7   : > { %1181 = vmatpush1.bf16.msra.mxu1 %v1446_v45 }
 0x1c8   : > { %1182 = vmatprep.subr.bf16.mxu1 %v1457_v9 }
 0x1cb   : > { %1183 = vmatpush1.bf16.msra.mxu1 %v1447_v48 }
 0x1cc   : > { %1184 = vmatprep.subr.bf16.mxu1 %v1457_v9  ;;  %v853_v9 = vsel %vm1646_vm15, %v1319_v61, %v852_v56 }
 0x1cd   : > { %v1325_v2 = vcombine.low %v853_v9, %v856_v0 }
 0x1cf   : > { %1185 = vmatpush1.bf16.msra.mxu1 %v1448_v53 }
 0x1d2   : > { %1195 = vmatmul.mubr.bf16.vlgmr.msra.gmra.mrb[8].mxu1 %v1324_v60 }
 0x1d3   : > { %1355 = vmatprep.mubr.msk.bf16.mxu1 %vm512_vm13, %v319_v59 }
 0x1da   : > { %1203 = vmatmul.mubr.bf16.gmra.mrb[12].mxu1 %v1325_v2 }
 0x275   : > { %v1384_v3 = vpop.f32.mrb[0].mxu1 }
 0x276   : > { %v1385_v4 = vpop.f32.mrb[1].mxu1 }
 0x277   : > { %v1386_v29 = vadd.f32 %v1385_v4, %v1384_v3  ;;  %v1387_v31 = vpop.f32.mrb[2].mxu1 }
 0x278   : > { %v1388_v47 = vpop.f32.mrb[3].mxu1 }
 0x279   : > { %v1389_v5 = vadd.f32 %v1388_v47, %v1387_v31 }
 0x27d   : > { %v1390_v6 = vpop.f32.mrb[4].mxu1 }
 0x27e   : > { %v1391_v1 = vpop.f32.mrb[5].mxu1 }
 0x27f   : > { %v1392_v7 = vadd.f32 %v1391_v1, %v1390_v6  ;;  %v1393_v8 = vpop.f32.mrb[6].mxu1 }
 0x280   : > { %v1394_v11 = vpop.f32.mrb[7].mxu1 }
 0x281   : > { %v1395_v12 = vadd.f32 %v1394_v11, %v1393_v8 }
 0x2a5   : > { %v1196_v52 = vpop.f32.mrb[8].mxu1 }
 0x2a6   : > { %v1197_v13 = vadd.f32 %v1386_v29, %v1196_v52  ;;  %v1198_v14 = vpop.f32.mrb[9].mxu1 }
 0x2a7   : > { %v1199_v15 = vpop.f32.mrb[10].mxu1 }
 0x2a8   : > { %1211 = vst [vmem:[%s285_s19] sm:$0xff] %v1197_v13  ;;  %v1200_v16 = vadd.f32 %v1389_v5, %v1199_v15  ;;  %v1201_v17 = vpop.f32.mrb[11].mxu1 }
 0x2aa   : > { %1212 = vst [vmem:[%s285_s19 + $0x8] sm:$0xff] %v1200_v16 }
 0x2ad   : > { %v1204_v18 = vpop.f32.mrb[12].mxu1 }
 0x2ae   : > { %v1205_v19 = vadd.f32 %v1392_v7, %v1204_v18  ;;  %v1206_v20 = vpop.f32.mrb[13].mxu1 }
 0x2af   : > { %v1207_v21 = vpop.f32.mrb[14].mxu1 }
 0x2b0   : > { %1213 = vst [vmem:[%s285_s19 + $0x10] sm:$0xff] %v1205_v19  ;;  %v1208_v23 = vadd.f32 %v1395_v12, %v1207_v21  ;;  %v1209_v24 = vpop.f32.mrb[15].mxu1 }
 0x2b2   : > { %1214 = vst [vmem:[%s285_s19 + $0x18] sm:$0xff] %v1208_v23 }
 0x2b3 PF: > { %s17_s24 = sadd.s32 1, %s1455_s24  }
 0x2b4   : > { %p14_p4 = scmp.ge.s32.totalorder %s17_s24, 4  }
 0x2b6   :  { %16 = sbr.rel (!%p14_p4) target bundleno = 1 (0x1), region = 78 }

</bundles_post_ra>
